<compile_context>
chip_gen: v7x
topology: tpu7x:2x2x1
jax: 0.10.0
libtpu: 0.0.40
codegen_flags: <defaults>
</compile_context>

<pallas_src>
import math

import jax
import jax.numpy as jnp
from jax.experimental import pallas as pl
from jax.experimental.pallas import tpu as pltpu

HIDDEN = 100  # fixed by the module: nn.Linear(dim_in, 100)


def _round_up(x, m):
    return ((x + m - 1) // m) * m


def _mlp_kernel(x_ref, w1_ref, b1_ref, w2_ref, b2_ref, out_ref):
    """x_ref:  (TN, dim_in)      VMEM f32
       w1_ref: (dim_in, HIDDEN)  VMEM f32   (already transposed to in x out)
       b1_ref: (1, HIDDEN)       VMEM f32
       w2_ref: (HIDDEN, dim_out) VMEM f32
       b2_ref: (1, dim_out)      VMEM f32
       out_ref:(TN, dim_out)     VMEM f32
    """
    h = jnp.dot(x_ref[...], w1_ref[...], preferred_element_type=jnp.float32)
    h = jnp.maximum(h + b1_ref[...], 0.0)                       # bias + ReLU (VPU)
    y = jnp.dot(h, w2_ref[...], preferred_element_type=jnp.float32) + b2_ref[...]
    out_ref[...] = y.astype(out_ref.dtype)                      # single wide store


def mlp_forward(x, w1, b1, w2, b2, *, tn=1024):
    """x: (N, ...) any trailing shape (flattened like torch .view(N, -1)).
       w1: (HIDDEN, dim_in) torch-layout Linear weight, b1: (HIDDEN,)
       w2: (dim_out, HIDDEN),                           b2: (dim_out,)
       Returns (N, dim_out) f32.
    """
    n = x.shape[0]
    x2 = x.reshape(n, -1).astype(jnp.float32)                   # glue: flatten
    dim_in = x2.shape[1]
    hidden = w1.shape[0]
    dim_out = w2.shape[0]

    # Tile the batch; pad N up so the grid covers it exactly (no ragged tile).
    tn = min(tn, _round_up(n, 8))
    n_pad = _round_up(n, tn)
    if n_pad != n:
        x2 = jnp.pad(x2, ((0, n_pad - n), (0, 0)))

    # Torch Linear computes x @ W.T + b; pre-transpose weights once (glue).
    w1_t = jnp.asarray(w1, jnp.float32).T                       # (dim_in, hidden)
    w2_t = jnp.asarray(w2, jnp.float32).T                       # (hidden, dim_out)
    b1_r = jnp.asarray(b1, jnp.float32).reshape(1, hidden)
    b2_r = jnp.asarray(b2, jnp.float32).reshape(1, dim_out)

    out = pl.pallas_call(
        _mlp_kernel,
        out_shape=jax.ShapeDtypeStruct((n_pad, dim_out), jnp.float32),
        grid_spec=pltpu.PrefetchScalarGridSpec(
            num_scalar_prefetch=0,
            grid=(n_pad // tn,),
            in_specs=[
                pl.BlockSpec((tn, dim_in), lambda i: (i, 0)),       # batch-tiled x
                pl.BlockSpec((dim_in, hidden), lambda i: (0, 0)),   # resident W1
                pl.BlockSpec((1, hidden), lambda i: (0, 0)),        # resident b1
                pl.BlockSpec((hidden, dim_out), lambda i: (0, 0)),  # resident W2
                pl.BlockSpec((1, dim_out), lambda i: (0, 0)),       # resident b2
            ],
            out_specs=pl.BlockSpec((tn, dim_out), lambda i: (i, 0)),
        ),
        compiler_params=pltpu.CompilerParams(
            dimension_semantics=("parallel",),   # shard batch tiles across TCs (v7x)
            vmem_limit_bytes=64 << 20,
        ),
    )(x2, w1_t, b1_r, w2_t, b2_r)
    return out[:n]


def _reference_forward(x, w1, b1, w2, b2):
    """Pure-JAX reference matching the PyTorch MLP.forward exactly."""
    x2 = x.reshape(x.shape[0], -1).astype(jnp.float32)
    h = jnp.maximum(x2 @ w1.T + b1, 0.0)
    return h @ w2.T + b2


if __name__ == "__main__":
    key = jax.random.PRNGKey(0)
    k_w1, k_b1, k_w2, k_b2, k_x = jax.random.split(key, 5)

    batch = 2
    x_shape = (batch, 4, 16)        # forward flattens -> dim_in = 64
    dim_in = 4 * 16
    dim_out = 10

    # Deterministic init mimicking nn.Linear default uniform(-1/sqrt(fan_in), ...).
    bound1 = 1.0 / math.sqrt(dim_in)
    w1 = jax.random.uniform(k_w1, (HIDDEN, dim_in), jnp.float32, -bound1, bound1)
    b1 = jax.random.uniform(k_b1, (HIDDEN,), jnp.float32, -bound1, bound1)
    bound2 = 1.0 / math.sqrt(HIDDEN)
    w2 = jax.random.uniform(k_w2, (dim_out, HIDDEN), jnp.float32, -bound2, bound2)
    b2 = jax.random.uniform(k_b2, (dim_out,), jnp.float32, -bound2, bound2)

    x = jax.random.normal(k_x, x_shape, jnp.float32)

    out = mlp_forward(x, w1, b1, w2, b2)
    jax.block_until_ready(out)

    expected = _reference_forward(x, w1, b1, w2, b2)
    assert out.shape == (batch, dim_out), out.shape
    if not jnp.allclose(out, expected, atol=1e-5, rtol=1e-5):
        raise AssertionError("Pallas kernel output does not match JAX reference")
    print("KERNEL_OK")
</pallas_src>

<mosaic_0001>
module attributes {stable_mosaic.version = 11 : i64} {
  func.func @_mlp_kernel(%arg0: i32, %arg1: memref<8x64xf32, #tpu.memory_space<vmem>>, %arg2: memref<64x100xf32, #tpu.memory_space<vmem>>, %arg3: memref<1x100xf32, #tpu.memory_space<vmem>>, %arg4: memref<100x10xf32, #tpu.memory_space<vmem>>, %arg5: memref<1x10xf32, #tpu.memory_space<vmem>>, %arg6: memref<8x10xf32, #tpu.memory_space<vmem>>) attributes {dimension_semantics = [#tpu.dimension_semantics<parallel>], iteration_bounds = array<i64: 1>, scalar_prefetch = 0 : i64, scratch_operands = 0 : i64, tpu.core_type = #tpu.core_type<tc>, window_params = [{transform_indices = @transform_0, window_bounds = array<i64: 8, 64>}, {pipeline_mode = #tpu.pipeline_mode<synchronous>, transform_indices = @transform_1, window_bounds = array<i64: 64, 100>}, {pipeline_mode = #tpu.pipeline_mode<synchronous>, transform_indices = @transform_2, window_bounds = array<i64: 1, 100>}, {pipeline_mode = #tpu.pipeline_mode<synchronous>, transform_indices = @transform_3, window_bounds = array<i64: 100, 10>}, {pipeline_mode = #tpu.pipeline_mode<synchronous>, transform_indices = @transform_4, window_bounds = array<i64: 1, 10>}, {transform_indices = @transform_5, window_bounds = array<i64: 8, 10>}]} {
    %c0 = arith.constant 0 : index
    %c0_0 = arith.constant 0 : index
    %0 = vector.load %arg1[%c0, %c0_0] : memref<8x64xf32, #tpu.memory_space<vmem>>, vector<8x64xf32>
    %c0_1 = arith.constant 0 : index
    %c0_2 = arith.constant 0 : index
    %1 = vector.load %arg2[%c0_1, %c0_2] : memref<64x100xf32, #tpu.memory_space<vmem>>, vector<64x100xf32>
    %cst = arith.constant dense<0.000000e+00> : vector<8x100xf32>
    %2 = tpu.matmul %0, %1, %cst {dimension_numbers = #tpu.dot_dimension_numbers<[1], [0], [0], [1], [0, 0, 1, 1], [], []>} : vector<8x64xf32>, vector<64x100xf32>, vector<8x100xf32> -> vector<8x100xf32>
    %c0_3 = arith.constant 0 : index
    %c0_4 = arith.constant 0 : index
    %3 = vector.load %arg3[%c0_3, %c0_4] : memref<1x100xf32, #tpu.memory_space<vmem>>, vector<1x100xf32>
    %4 = vector.broadcast %3 : vector<1x100xf32> to vector<8x100xf32>
    %5 = arith.addf %2, %4 : vector<8x100xf32>
    %cst_5 = arith.constant 0.000000e+00 : f32
    %6 = vector.broadcast %cst_5 : f32 to vector<8x100xf32>
    %7 = arith.maximumf %5, %6 : vector<8x100xf32>
    %c0_6 = arith.constant 0 : index
    %c0_7 = arith.constant 0 : index
    %8 = vector.load %arg4[%c0_6, %c0_7] : memref<100x10xf32, #tpu.memory_space<vmem>>, vector<100x10xf32>
    %cst_8 = arith.constant dense<0.000000e+00> : vector<8x10xf32>
    %9 = tpu.matmul %7, %8, %cst_8 {dimension_numbers = #tpu.dot_dimension_numbers<[1], [0], [0], [1], [0, 0, 1, 1], [], []>} : vector<8x100xf32>, vector<100x10xf32>, vector<8x10xf32> -> vector<8x10xf32>
    %c0_9 = arith.constant 0 : index
    %c0_10 = arith.constant 0 : index
    %10 = vector.load %arg5[%c0_9, %c0_10] : memref<1x10xf32, #tpu.memory_space<vmem>>, vector<1x10xf32>
    %11 = vector.broadcast %10 : vector<1x10xf32> to vector<8x10xf32>
    %12 = arith.addf %9, %11 : vector<8x10xf32>
    %c0_11 = arith.constant 0 : index
    %c0_12 = arith.constant 0 : index
    %13 = vector.load %arg6[%c0_11, %c0_12] : memref<8x10xf32, #tpu.memory_space<vmem>>, vector<8x10xf32>
    tpu.vector_store %arg6[%c0_11, %c0_12], %12 {strides = array<i32>} : memref<8x10xf32, #tpu.memory_space<vmem>>, vector<8x10xf32>,
    return
  }
  func.func @transform_0(%arg0: i32) -> (i32, i32) {
    %c0_i32 = arith.constant 0 : i32
    %c0_i32_0 = arith.constant 0 : i32
    return %arg0, %c0_i32 : i32, i32
  }
  func.func @transform_1(%arg0: i32) -> (i32, i32) {
    %c0_i32 = arith.constant 0 : i32
    %c0_i32_0 = arith.constant 0 : i32
    %c0_i32_1 = arith.constant 0 : i32
    return %c0_i32, %c0_i32_0 : i32, i32
  }
  func.func @transform_2(%arg0: i32) -> (i32, i32) {
    %c0_i32 = arith.constant 0 : i32
    %c0_i32_0 = arith.constant 0 : i32
    %c0_i32_1 = arith.constant 0 : i32
    return %c0_i32, %c0_i32_0 : i32, i32
  }
  func.func @transform_3(%arg0: i32) -> (i32, i32) {
    %c0_i32 = arith.constant 0 : i32
    %c0_i32_0 = arith.constant 0 : i32
    %c0_i32_1 = arith.constant 0 : i32
    return %c0_i32, %c0_i32_0 : i32, i32
  }
  func.func @transform_4(%arg0: i32) -> (i32, i32) {
    %c0_i32 = arith.constant 0 : i32
    %c0_i32_0 = arith.constant 0 : i32
    %c0_i32_1 = arith.constant 0 : i32
    return %c0_i32, %c0_i32_0 : i32, i32
  }
  func.func @transform_5(%arg0: i32) -> (i32, i32) {
    %c0_i32 = arith.constant 0 : i32
    %c0_i32_0 = arith.constant 0 : i32
    return %arg0, %c0_i32 : i32, i32
  }
}

</mosaic_0001>

<bundles_post_ra>
// kernel: tpu_custom_call.1
= control target key start
LH: loop header
LB: loop body
LE: loop exit
PB: predicated region body
PF: predicated region fallthrough
CT: control target
= control target key end

     0   :  { %10 = vsyncpa [#allocation3], 0  ;;  %s661_s0 = inlined_call_operand.hbm [shape: f32[8,64], index: 0, kind: input, shape index: {}]   ;;  %s662_s1 = inlined_call_operand.hbm [shape: f32[64,100], index: 1, kind: input, shape index: {}]   ;;  %s663_s2 = inlined_call_operand.hbm [shape: f32[1,100], index: 2, kind: input, shape index: {}]   ;;  %s664_s3 = inlined_call_operand.hbm [shape: f32[100,10], index: 3, kind: input, shape index: {}]   ;;  %s665_s4 = inlined_call_operand.hbm [shape: f32[1,10], index: 4, kind: input, shape index: {}]   ;;  %s666_s5 = inlined_call_operand.hbm [shape: f32[8,10], index: 5, kind: output, shape index: {}]  }
   0x1   :  { %11 = vsyncpa [#allocation6], 0 }
   0x2   :  { %12 = vsyncpa [#allocation9], 0 }
   0x3   :  { %13 = vsyncpa [#allocation4], 0  ;;  %s548_s18 = smov [#allocation5]   ;;  %s408_s22 = scalar_lea.hbm %s662_s1, 1024 }
   0x4   :  { %s29_s19 = sshll.u32 %s548_s18, 4  ;;  %p409_p0 = scmp.ne.s32.totalorder %s662_s1, %s408_s22  ;;  %s30_s19 = int_to_ptr.vmem [resolvable:$true] %s29_s19 }
   0x5   :  { %p412_p1 = scmp.lt.u32.totalorder %s408_s22, %s662_s1 }
   0x7   :  { %p414_p2 = pnand %p412_p1, %p409_p0 }
   0x9   :  { %417 = shalt.err (!%p414_p2)
}
   0xa   :  { %s418_s27 = scalar_lea.vmem %s30_s19, 1024  ;;  %p423_p4 = scmp.lt.s32.totalorder %s30_s19, %s30_s19 }
   0xb   :  { %p419_p3 = scmp.ne.s32.totalorder %s30_s19, %s418_s27  ;;  %p424_p5 = scmp.lt.s32.totalorder %s418_s27, %s418_s27 }
   0xd   :  { %p425_p6 = por %p424_p5, %p423_p4 }
   0xf   :  { %p426_p7 = pnand %p425_p6, %p419_p3 }
  0x11   :  { %429 = shalt.err (!%p426_p7)
}
  0x12   :  { %s549_s28 = smov 128   ;;  %s550_s29 = smov 8  }
  0x13   :  { %35 = dma.hbm_to_vmem [thread:$0]  %s662_s1, 1024, %s30_s19, [#allocation6], %s549_s28, %s549_s28, %s550_s29  }
  0x14   :  { %s551_s7 = smov [#allocation8]   ;;  %s552_s9 = smov [#allocation2]  }
  0x15   :  { %s51_s8 = sshll.u32 %s551_s7, 4  ;;  %s20_s10 = sshll.u32 %s552_s9, 4  ;;  %s52_s8 = int_to_ptr.vmem [resolvable:$true] %s51_s8  ;;  %s21_s10 = int_to_ptr.vmem [resolvable:$true] %s20_s10 }
  0x16   :  { %s430_s13 = scalar_lea.hbm %s664_s3, 1664 }
  0x17   :  { %p431_p8 = scmp.ne.s32.totalorder %s664_s3, %s430_s13  ;;  %p434_p9 = scmp.lt.u32.totalorder %s430_s13, %s664_s3 }
  0x19   :  { %p436_p10 = pnand %p434_p9, %p431_p8 }
  0x1b   :  { %439 = shalt.err (!%p436_p10)
}
  0x1c   :  { %s440_s1 = scalar_lea.vmem %s52_s8, 1664  ;;  %p445_p12 = scmp.lt.s32.totalorder %s52_s8, %s52_s8 }
  0x1d   :  { %p441_p11 = scmp.ne.s32.totalorder %s52_s8, %s440_s1  ;;  %p446_p13 = scmp.lt.s32.totalorder %s440_s1, %s440_s1 }
  0x1f   :  { %p447_p0 = por %p446_p13, %p445_p12 }
  0x21   :  { %p448_p1 = pnand %p447_p0, %p441_p11 }
  0x23   :  { %451 = shalt.err (!%p448_p1)
}
  0x24   :  { %57 = dma.hbm_to_vmem [thread:$0]  %s664_s3, 1664, %s52_s8, [#allocation9], %s549_s28, %s549_s28, %s550_s29  }
  0x25   :  { %s452_s22 = scalar_lea.hbm %s661_s0, 128 }
  0x26   :  { %p453_p2 = scmp.ne.s32.totalorder %s661_s0, %s452_s22  ;;  %p456_p3 = scmp.lt.u32.totalorder %s452_s22, %s661_s0 }
  0x28   :  { %p458_p4 = pnand %p456_p3, %p453_p2 }
  0x2a   :  { %461 = shalt.err (!%p458_p4)
}
  0x2b   :  { %s462_s27 = scalar_lea.vmem %s21_s10, 128  ;;  %p467_p6 = scmp.lt.s32.totalorder %s21_s10, %s21_s10 }
  0x2c   :  { %p463_p5 = scmp.ne.s32.totalorder %s21_s10, %s462_s27  ;;  %p468_p7 = scmp.lt.s32.totalorder %s462_s27, %s462_s27 }
  0x2e   :  { %p469_p8 = por %p468_p7, %p467_p6 }
  0x30   :  { %p470_p9 = pnand %p469_p8, %p463_p5 }
  0x32   :  { %473 = shalt.err (!%p470_p9)
}
  0x33   :  { %23 = dma.hbm_to_vmem [thread:$0]  %s661_s0, 128, %s21_s10, [#allocation3]  }
  0x34   :  { %s553_s29 = smov [#allocation7]   ;;  %s554_s6 = smov [#allocation10]  }
  0x35   :  { %s42_s30 = sshll.u32 %s553_s29, 4  ;;  %s64_s7 = sshll.u32 %s554_s6, 4  ;;  %s43_s30 = int_to_ptr.vmem [resolvable:$true] %s42_s30  ;;  %s65_s7 = int_to_ptr.vmem [resolvable:$true] %s64_s7 }
  0x36   :  { %s474_s11 = scalar_lea.hbm %s663_s2, 16 }
  0x37   :  { %p475_p10 = scmp.ne.s32.totalorder %s663_s2, %s474_s11  ;;  %p478_p11 = scmp.lt.u32.totalorder %s474_s11, %s663_s2 }
  0x39   :  { %p480_p12 = pnand %p478_p11, %p475_p10 }
  0x3b   :  { %483 = shalt.err (!%p480_p12)
}
  0x3c   :  { %s484_s0 = scalar_lea.vmem %s43_s30, 16  ;;  %s488_s10 = scalar_lea.vmem %s43_s30, 32 }
  0x3d   :  { %p485_p13 = scmp.ne.s32.totalorder %s43_s30, %s484_s0  ;;  %p489_p0 = scmp.lt.s32.totalorder %s43_s30, %s43_s30 }
  0x3e   :  { %p490_p1 = scmp.lt.s32.totalorder %s488_s10, %s484_s0 }
  0x40   :  { %p491_p2 = por %p490_p1, %p489_p0 }
  0x42   :  { %p492_p3 = pnand %p491_p2, %p485_p13 }
  0x44   :  { %495 = shalt.err (!%p492_p3)
}
  0x45   :  { %45 = dma.hbm_to_vmem [thread:$0]  %s663_s2, 16, %s43_s30, [#allocation6]  }
  0x46   :  { %s496_s19 = scalar_lea.hbm %s665_s4, 16 }
  0x47   :  { %p497_p4 = scmp.ne.s32.totalorder %s665_s4, %s496_s19  ;;  %p500_p5 = scmp.lt.u32.totalorder %s496_s19, %s665_s4 }
  0x49   :  { %p502_p6 = pnand %p500_p5, %p497_p4 }
  0x4b   :  { %505 = shalt.err (!%p502_p6)
}
  0x4c   :  { %s506_s24 = scalar_lea.vmem %s65_s7, 16  ;;  %s510_s25 = scalar_lea.vmem %s65_s7, 32 }
  0x4d   :  { %p507_p7 = scmp.ne.s32.totalorder %s65_s7, %s506_s24  ;;  %p511_p8 = scmp.lt.s32.totalorder %s65_s7, %s65_s7 }
  0x4e   :  { %p512_p9 = scmp.lt.s32.totalorder %s510_s25, %s506_s24 }
  0x50   :  { %p513_p10 = por %p512_p9, %p511_p8 }
  0x52   :  { %p514_p11 = pnand %p513_p10, %p507_p7 }
  0x54   :  { %517 = shalt.err (!%p514_p11)
}
  0x55   :  { %67 = dma.hbm_to_vmem [thread:$0]  %s665_s4, 16, %s65_s7, [#allocation9]  }
  0x56   :  { %540 = dma.done.wait [#allocation3], 128  }
  0x57   :  { %541 = vsyncadd [#allocation3], 4294967168 }
  0x58   :  { %542 = dma.done.wait [#allocation6], 1040  }
  0x59   :  { %543 = vsyncadd [#allocation6], 4294966256 }
  0x5a   :  { %544 = dma.done.wait [#allocation9], 1680  }
  0x5b   :  { %545 = vsyncadd [#allocation9], 4294965616  ;;  %v555_v0 = vmov 0.0|0.0   ;;  %vm556_vm0 = vmmov 0   ;;  %v557_v1 = vmov 0.0   ;;  %v84_v2 = vld [vmem:[#allocation5] sm:$0xff] }
  0x5c   :  { %367 = vmatprep.subr.bf16.mxu0 %v555_v0  ;;  %335 = vmatprep.mubr.msk.f32.mxu0 %vm556_vm0, %v557_v1  ;;  %v85_v3 = vld [vmem:[#allocation5 + $0x8] sm:$0xff]  ;;  %v86_v4 = vld [vmem:[#allocation5 + $0x10] sm:$0xff]  ;;  %v87_v6 = vld [vmem:[#allocation5 + $0x18] sm:$0xff]  ;;  %vm99_vm1 = vcmask 523264   ;;  %vm198_vm2 = vcmask 1043456   ;;  %vm194_vm3 = vcmask 818176  }
  0x5d   :  { %379 = vmatprep.subr.bf16.mxu1 %v555_v0  ;;  %364 = vmatprep.mubr.msk.f32.mxu1 %vm556_vm0, %v557_v1  ;;  %v368_v5 = vpack.c.bf16 %v85_v3, %v84_v2  ;;  %v371_v7 = vpack.c.bf16 %v87_v6, %v86_v4  ;;  %v174_v8 = vld [vmem:[#allocation8] sm:$0xff]  ;;  %v175_v9 = vld [vmem:[#allocation8 + $0x8] sm:$0xff]  ;;  %v176_v10 = vld [vmem:[#allocation8 + $0x10] sm:$0xff]  ;;  %s558_s4 = smov [#allocation11]   ;;  %vm272_vm4 = vcmask 80896  }
  0x5e   :  { %v88_v11 = vld [vmem:[#allocation5 + $0x20] sm:$0xff]  ;;  %v89_v12 = vld [vmem:[#allocation5 + $0x28] sm:$0xff]  ;;  %v380_v13 = vpack.c.bf16 %v175_v9, %v174_v8  ;;  %v90_v19 = vld [vmem:[#allocation5 + $0x30] sm:$0xff]  ;;  %s280_s27 = sshll.u32 %s558_s4, 4  ;;  %s281_s27 = int_to_ptr.vmem [resolvable:$true] %s280_s27 }
  0x5f   :  { %369 = vmatpush3.bf16.msra.mxu0 %v368_v5  ;;  %v177_v14 = vld [vmem:[#allocation8 + $0x18] sm:$0xff]  ;;  %v374_v16 = vpack.c.bf16 %v89_v12, %v88_v11  ;;  %v178_v17 = vld [vmem:[#allocation8 + $0x20] sm:$0xff]  ;;  %v179_v18 = vld [vmem:[#allocation8 + $0x28] sm:$0xff]  ;;  %s518_s3 = scalar_lea.vmem %s281_s27, 128  ;;  %p523_p13 = scmp.lt.s32.totalorder %s281_s27, %s281_s27 }
  0x60   :  { %370 = vmatprep.subr.bf16.mxu0 %v555_v0  ;;  %381 = vmatpush3.bf16.msra.mxu1 %v380_v13  ;;  %v383_v15 = vpack.c.bf16 %v177_v14, %v176_v10  ;;  %v91_v20 = vld [vmem:[#allocation5 + $0x38] sm:$0xff]  ;;  %v386_v21 = vpack.c.bf16 %v179_v18, %v178_v17  ;;  %v182_v27 = vld [vmem:[#allocation8 + $0x40] sm:$0xff]  ;;  %v183_v28 = vld [vmem:[#allocation8 + $0x48] sm:$0xff]  ;;  %p519_p12 = scmp.ne.s32.totalorder %s281_s27, %s518_s3  ;;  %p524_p0 = scmp.lt.s32.totalorder %s518_s3, %s518_s3 }
  0x61   :  { %382 = vmatprep.subr.bf16.mxu1 %v555_v0  ;;  %v377_v22 = vpack.c.bf16 %v91_v20, %v90_v19  ;;  %v180_v23 = vld [vmem:[#allocation8 + $0x30] sm:$0xff]  ;;  %v181_v24 = vld [vmem:[#allocation8 + $0x38] sm:$0xff]  ;;  %v392_v29 = vpack.c.bf16 %v183_v28, %v182_v27  ;;  %v186_v33 = vld [vmem:[#allocation8 + $0x60] sm:$0xf] }
  0x62   :  { %v389_v25 = vpack.c.bf16 %v181_v24, %v180_v23  ;;  %v83_v26 = vld [vmem:[#allocation2] sm:$0xff]  ;;  %v291_v34 = vld [vmem:[#allocation7] ss:$0 sm:$0xff]  ;;  %v293_v39 = vld [vmem:[#allocation10] ss:$0 sm:$0xff]  ;;  %p525_p1 = por %p524_p0, %p523_p13 }
  0x63   :  { %372 = vmatpush3.bf16.msra.mxu0 %v371_v7  ;;  %v184_v30 = vld [vmem:[#allocation8 + $0x50] sm:$0xff]  ;;  %v185_v31 = vld [vmem:[#allocation8 + $0x58] sm:$0xff] }
  0x64   :  { %373 = vmatprep.subr.bf16.mxu0 %v555_v0  ;;  %384 = vmatpush3.bf16.msra.mxu1 %v383_v15  ;;  %v395_v32 = vpack.c.bf16 %v185_v31, %v184_v30  ;;  %p526_p2 = pnand %p525_p1, %p519_p12 }
  0x65   :  { %385 = vmatprep.subr.bf16.mxu1 %v555_v0 }
  0x67   :  { %375 = vmatpush3.bf16.msra.mxu0 %v374_v16 }
  0x68   :  { %376 = vmatprep.subr.bf16.mxu0 %v555_v0  ;;  %387 = vmatpush3.bf16.msra.mxu1 %v386_v21 }
  0x69   :  { %388 = vmatprep.subr.bf16.mxu1 %v555_v0 }
  0x6b   :  { %378 = vmatpush3.bf16.msra.mxu0 %v377_v22 }
  0x6c   :  { %390 = vmatpush3.bf16.msra.mxu1 %v389_v25 }
  0x6d   :  { %391 = vmatprep.subr.bf16.mxu1 %v555_v0 }
  0x6e   :  { %336 = vmatmul.mubr.msk.f32.vlgmr.msra.gmra.mrb[0].mxu0 %vm99_vm1, %v83_v26 }
  0x70   :  { %393 = vmatpush3.bf16.msra.mxu1 %v392_v29 }
  0x71   :  { %394 = vmatprep.subr.bf16.mxu1 %v555_v0 }
  0x74   :  { %396 = vmatpush3.bf16.msra.mxu1 %v395_v32 }
  0x75   :  { %362 = vmatprep.subr.mxu1 %v557_v1 }
  0x78   :  { %363 = vmatpush3.msk.msra.mxu1 %vm198_vm2, %v186_v33 }
 0x141   :  { %v169_v35 = vpop.f32.mrb[0].mxu0 }
 0x142   :  { %v170_v36 = vadd.f32 %v291_v34, %v169_v35  ;;  %v337_v37 = vpop.f32.mrb[1].mxu0 }
 0x144   :  { %v173_v38 = vmax.f32 %v170_v36, 0.0 }
 0x146   :  { %365 = vmatmul.mubr.msk.f32.vlgmr.msra.gmra.mrb[0].mxu1 %vm194_vm3, %v173_v38 }
 0x219   :  { %v268_v40 = vpop.f32.mrb[0].mxu1 }
 0x21a   :  { %v269_v41 = vadd.f32 %v293_v39, %v268_v40  ;;  %v366_v42 = vpop.f32.mrb[1].mxu1 }
 0x21c   :  { %273 = vst.msk [vmem:[#allocation11] sm:$0xff] %vm272_vm4, %v269_v41 }
 0x21d   :  { %529 = shalt.err (!%p526_p2)
}
 0x21e   :  { %s530_s30 = scalar_lea.hbm %s666_s5, 128 }
 0x21f   :  { %p531_p3 = scmp.ne.s32.totalorder %s666_s5, %s530_s30  ;;  %p534_p4 = scmp.lt.u32.totalorder %s530_s30, %s666_s5 }
 0x221   :  { %p536_p5 = pnand %p534_p4, %p531_p3 }
 0x223   :  { %539 = shalt.err (!%p536_p5)
}
 0x224   :  { %283 = dma.vmem_to_hbm [thread:$0]  %s281_s27, 128, %s666_s5, [#allocation4]  }
 0x225   :  { %546 = dma.done.wait [#allocation4], 128  }
 0x226   :  { %547 = vsyncadd [#allocation4], 4294967168 }
 0x227   :  { %287 = vsyncpa [#allocation3], 1 }
 0x228   :  { %288 = vsyncpa [#allocation6], 1 }
 0x229   :  { %289 = vsyncpa [#allocation9], 1 }
 0x22a   :  { %290 = vsyncpa [#allocation4], 1 }

</bundles_post_ra>
